<compile_context>
chip_gen: v7x
topology: tpu7x:2x2x1
jax: 0.10.0
libtpu: 0.0.40
codegen_flags: <defaults>
</compile_context>

<pallas_src>
import functools

import jax
import jax.numpy as jnp
from jax.experimental import pallas as pl
from jax.experimental.pallas import tpu as pltpu

_LN2 = 0.6931471805599453


def _round_up(x, m):
    return ((x + m - 1) // m) * m


def _js_div_kernel(p_ref, q_ref, out_ref, acc_ref, *, total_rows, row_tile,
                   steps_per_core):
    c = pl.program_id(0)          # TensorCore split (parallel)
    i = pl.program_id(1)          # row-tile step within this core (arbitrary)

    @pl.when(i == 0)
    def _():
        acc_ref[...] = jnp.zeros_like(acc_ref)

    # Native-dtype tiles (e.g. bf16) cast to f32 in VMEM.
    p = p_ref[...].astype(jnp.float32)
    q = q_ref[...].astype(jnp.float32)

    # Numerically stable softmax pieces over the last (lane) axis.
    p_shift = p - jnp.max(p, axis=-1, keepdims=True)
    q_shift = q - jnp.max(q, axis=-1, keepdims=True)
    p_exp = jnp.exp(p_shift)
    q_exp = jnp.exp(q_shift)
    p_sum = jnp.sum(p_exp, axis=-1, keepdims=True)          # (rt, 1)
    q_sum = jnp.sum(q_exp, axis=-1, keepdims=True)          # (rt, 1)

    # One reciprocal per row instead of V per-element divides.
    p_s = p_exp * pl.reciprocal(p_sum, approx=False)
    q_s = q_exp * pl.reciprocal(q_sum, approx=False)
    t = p_s + q_s

    # Per-element term (3 transcendentals/elem: exp, exp, log — irreducible).
    elem = p_s * p_shift + q_s * q_shift - t * jnp.log(t)

    # Lane reduce (XLU) to a per-row partial, then fold per-row constants.
    row_part = jnp.sum(elem, axis=-1, keepdims=True)         # (rt, 1)
    row_part = row_part - jnp.log(p_sum) - jnp.log(q_sum) + 2.0 * _LN2

    row0 = (c * steps_per_core + i) * row_tile

    # Fast path: tile fully inside the valid row range — no mask work at all.
    @pl.when(row0 + row_tile <= total_rows)
    def _():
        acc_ref[...] += row_part

    # Tail path: mask rows past total_rows (garbage / re-read rows give NaN/Inf
    # only inside their own masked rows and are discarded here).
    @pl.when(row0 + row_tile > total_rows)
    def _():
        rows = row0 + jax.lax.broadcasted_iota(jnp.int32, (row_tile, 1), 0)
        acc_ref[...] += jnp.where(rows < total_rows, row_part, 0.0)

    @pl.when(i == pl.num_programs(1) - 1)
    def _():
        total = jnp.sum(acc_ref[...], keepdims=True)          # (1, 1) sublane reduce
        out_ref[...] = total.reshape(1, 1, 1) * (0.5 / total_rows)


def _tpu_vmem_capacity_bytes():
    try:
        return int(pltpu.get_tpu_info().vmem_capacity_bytes)
    except Exception:
        return 64 * 1024 * 1024   # conservative: v7x per-TC capacity


def _num_tensorcores():
    try:
        kind = jax.devices()[0].device_kind.lower()
    except Exception:
        return 1
    # Two TensorCores per device on v7x (and v4 megacore); one on v5e/v6e.
    return 2 if ("v7" in kind or "v4" in kind) else 1


def js_div(p, q, *, max_row_tile=512, num_splits=None):
    """JS divergence between softmax(p, -1) and softmax(q, -1). Scalar f32."""
    assert p.shape == q.shape
    V = p.shape[-1]
    p2 = jnp.reshape(p, (-1, V))
    q2 = jnp.reshape(q, (-1, V))
    N = p2.shape[0]
    itemsize = jnp.dtype(p2.dtype).itemsize

    if num_splits is None:
        num_splits = _num_tensorcores()

    # Generation-aware VMEM sizing derived from the real per-core capacity
    # (128 MiB on v5e/v6e, 64 MiB on v7x).
    vmem_cap = _tpu_vmem_capacity_bytes()
    vmem_limit = min(int(0.6 * vmem_cap), 96 * 1024 * 1024)
    budget = min(int(0.3 * vmem_cap), 28 * 1024 * 1024)

    # Estimated bytes/row: 2 inputs x 2 pipeline buffers (native dtype) plus
    # ~13 live (row_tile, V) f32 temps; no full-width accumulator any more.
    bytes_per_row = V * (4 * itemsize + 13 * 4)
    row_tile = (budget // bytes_per_row) // 8 * 8
    row_tile = int(max(8, min(row_tile, max_row_tile)))
    # TODO(synk): for LLM-scale vocab (V >= ~64k) add a V-chunked two-pass /
    # online-softmax path; at row_tile=8 the f32 temps alone exceed v7x VMEM.

    # Don't over-tile tiny inputs, and don't hand a core zero valid rows.
    row_tile = min(row_tile, _round_up(-(-N // num_splits), 8))
    if num_splits > 1 and N <= row_tile:
        num_splits = 1

    steps = -(-N // (num_splits * row_tile))      # row-tile steps per core
    last_block = -(-N // row_tile) - 1            # last block with valid rows

    def in_map(c, i):
        # Clamp so fully out-of-range tiles just re-read the last valid block
        # (their contribution is masked to zero in-kernel).
        return (jnp.minimum(c * steps + i, last_block), 0)

    kernel = functools.partial(
        _js_div_kernel, total_rows=N, row_tile=row_tile, steps_per_core=steps)

    partials = pl.pallas_call(
        kernel,
        out_shape=jax.ShapeDtypeStruct((num_splits, 1, 1), jnp.float32),
        grid_spec=pltpu.PrefetchScalarGridSpec(
            num_scalar_prefetch=0,
            grid=(num_splits, steps),
            in_specs=[
                pl.BlockSpec((row_tile, V), in_map),
                pl.BlockSpec((row_tile, V), in_map),
            ],
            out_specs=pl.BlockSpec((1, 1, 1), lambda c, i: (c, 0, 0)),
            scratch_shapes=[pltpu.VMEM((row_tile, 1), jnp.float32)],
        ),
        compiler_params=pltpu.CompilerParams(
            dimension_semantics=("parallel", "arbitrary"),
            vmem_limit_bytes=vmem_limit),
    )(p2, q2)
    return jnp.sum(partials)


def _js_div_ref(p, q):
    V = p.shape[-1]
    p2 = jnp.reshape(p, (-1, V)).astype(jnp.float32)
    q2 = jnp.reshape(q, (-1, V)).astype(jnp.float32)
    N = p2.shape[0]
    p_s = jax.nn.softmax(p2, axis=-1)
    q_s = jax.nn.softmax(q2, axis=-1)
    m = jnp.log(0.5 * (p_s + q_s))
    kl_pm = jnp.sum(p_s * (jnp.log(p_s) - m)) / N
    kl_qm = jnp.sum(q_s * (jnp.log(q_s) - m)) / N
    return 0.5 * (kl_pm + kl_qm)


if __name__ == "__main__":
    key = jax.random.PRNGKey(0)
    kp, kq, kp2, kq2 = jax.random.split(key, 4)

    # Case 1: (batch=2, seq=8, vocab=128) f32 logits -> 16 rows of width 128.
    p = jax.random.normal(kp, (2, 8, 128), dtype=jnp.float32)
    q = jax.random.normal(kq, (2, 8, 128), dtype=jnp.float32)
    out = jax.block_until_ready(js_div(p, q))
    ref = _js_div_ref(p, q)
    assert jnp.allclose(out, ref, rtol=1e-4, atol=1e-6), (out, ref)

    # Case 2: ragged row count (exercises the no-pad overhang + mask path).
    p_r = jax.random.normal(kp2, (3, 5, 256), dtype=jnp.float32)
    q_r = jax.random.normal(kq2, (3, 5, 256), dtype=jnp.float32)
    out_r = jax.block_until_ready(js_div(p_r, q_r))
    ref_r = _js_div_ref(p_r, q_r)
    assert jnp.allclose(out_r, ref_r, rtol=1e-4, atol=1e-6), (out_r, ref_r)

    print("KERNEL_OK")
</pallas_src>

<mosaic_0001>
module attributes {stable_mosaic.version = 11 : i64} {
  func.func @_js_div_kernel(%arg0: i32, %arg1: i32, %arg2: memref<16x128xf32, #tpu.memory_space<vmem>>, %arg3: memref<16x128xf32, #tpu.memory_space<vmem>>, %arg4: memref<1x1x1xf32, #tpu.memory_space<vmem>>, %arg5: memref<16x1xf32, #tpu.memory_space<vmem>>) attributes {dimension_semantics = [#tpu.dimension_semantics<parallel>, #tpu.dimension_semantics<arbitrary>], iteration_bounds = array<i64: 1, 1>, scalar_prefetch = 0 : i64, scratch_operands = 1 : i64, tpu.core_type = #tpu.core_type<tc>, window_params = [{transform_indices = @transform_0, window_bounds = array<i64: 16, 128>}, {transform_indices = @transform_1, window_bounds = array<i64: 16, 128>}, {transform_indices = @transform_2, window_bounds = array<i64: 1, 1, 1>}]} {
    %c0_i32 = arith.constant 0 : i32
    %0 = arith.cmpi eq, %arg1, %c0_i32 : i32
    %1 = arith.extui %0 : i1 to i32
    %c0_i32_0 = arith.constant 0 : i32
    %2 = arith.cmpi ne, %1, %c0_i32_0 : i32
    scf.if %2 {
      %cst_17 = arith.constant 0.000000e+00 : f32
      %54 = vector.broadcast %cst_17 : f32 to vector<16x1xf32>
      %c0_18 = arith.constant 0 : index
      %c0_19 = arith.constant 0 : index
      %55 = vector.load %arg5[%c0_18, %c0_19] : memref<16x1xf32, #tpu.memory_space<vmem>>, vector<16x1xf32>
      tpu.vector_store %arg5[%c0_18, %c0_19], %54 {strides = array<i32>} : memref<16x1xf32, #tpu.memory_space<vmem>>, vector<16x1xf32>,
    } else {
    }
    %c0 = arith.constant 0 : index
    %c0_1 = arith.constant 0 : index
    %3 = vector.load %arg2[%c0, %c0_1] : memref<16x128xf32, #tpu.memory_space<vmem>>, vector<16x128xf32>
    %c0_2 = arith.constant 0 : index
    %c0_3 = arith.constant 0 : index
    %4 = vector.load %arg3[%c0_2, %c0_3] : memref<16x128xf32, #tpu.memory_space<vmem>>, vector<16x128xf32>
    %cst = arith.constant dense<0xFF800000> : vector<16xf32>
    %5 = vector.multi_reduction <maximumf>, %3, %cst [1] : vector<16x128xf32> to vector<16xf32>
    %6 = vector.shape_cast %5 : vector<16xf32> to vector<16x1xf32>
    %7 = vector.broadcast %6 : vector<16x1xf32> to vector<16x128xf32>
    %8 = arith.subf %3, %7 : vector<16x128xf32>
    %cst_4 = arith.constant dense<0xFF800000> : vector<16xf32>
    %9 = vector.multi_reduction <maximumf>, %4, %cst_4 [1] : vector<16x128xf32> to vector<16xf32>
    %10 = vector.shape_cast %9 : vector<16xf32> to vector<16x1xf32>
    %11 = vector.broadcast %10 : vector<16x1xf32> to vector<16x128xf32>
    %12 = arith.subf %4, %11 : vector<16x128xf32>
    %13 = math.exp %8 : vector<16x128xf32>
    %14 = math.exp %12 : vector<16x128xf32>
    %cst_5 = arith.constant dense<0.000000e+00> : vector<16xf32>
    %15 = vector.multi_reduction <add>, %13, %cst_5 [1] : vector<16x128xf32> to vector<16xf32>
    %16 = vector.shape_cast %15 : vector<16xf32> to vector<16x1xf32>
    %cst_6 = arith.constant dense<0.000000e+00> : vector<16xf32>
    %17 = vector.multi_reduction <add>, %14, %cst_6 [1] : vector<16x128xf32> to vector<16xf32>
    %18 = vector.shape_cast %17 : vector<16xf32> to vector<16x1xf32>
    %19 = tpu.reciprocal %16 : vector<16x1xf32> -> vector<16x1xf32>
    %20 = vector.broadcast %19 : vector<16x1xf32> to vector<16x128xf32>
    %21 = arith.mulf %13, %20 : vector<16x128xf32>
    %22 = tpu.reciprocal %18 : vector<16x1xf32> -> vector<16x1xf32>
    %23 = vector.broadcast %22 : vector<16x1xf32> to vector<16x128xf32>
    %24 = arith.mulf %14, %23 : vector<16x128xf32>
    %25 = arith.addf %21, %24 : vector<16x128xf32>
    %26 = arith.mulf %21, %8 : vector<16x128xf32>
    %27 = arith.mulf %24, %12 : vector<16x128xf32>
    %28 = arith.addf %26, %27 : vector<16x128xf32>
    %29 = math.log %25 : vector<16x128xf32>
    %30 = arith.mulf %25, %29 : vector<16x128xf32>
    %31 = arith.subf %28, %30 : vector<16x128xf32>
    %cst_7 = arith.constant dense<0.000000e+00> : vector<16xf32>
    %32 = vector.multi_reduction <add>, %31, %cst_7 [1] : vector<16x128xf32> to vector<16xf32>
    %33 = vector.shape_cast %32 : vector<16xf32> to vector<16x1xf32>
    %34 = math.log %16 : vector<16x1xf32>
    %35 = arith.subf %33, %34 : vector<16x1xf32>
    %36 = math.log %18 : vector<16x1xf32>
    %37 = arith.subf %35, %36 : vector<16x1xf32>
    %cst_8 = arith.constant 1.38629436 : f32
    %38 = vector.broadcast %cst_8 : f32 to vector<16x1xf32>
    %39 = arith.addf %37, %38 : vector<16x1xf32>
    %c1_i32 = arith.constant 1 : i32
    %40 = arith.muli %arg0, %c1_i32 : i32
    %41 = arith.addi %40, %arg1 : i32
    %c16_i32 = arith.constant 16 : i32
    %42 = arith.muli %41, %c16_i32 : i32
    %c16_i32_9 = arith.constant 16 : i32
    %43 = arith.addi %42, %c16_i32_9 : i32
    %c16_i32_10 = arith.constant 16 : i32
    %44 = arith.cmpi sle, %43, %c16_i32_10 : i32
    %45 = arith.extui %44 : i1 to i32
    %c0_i32_11 = arith.constant 0 : i32
    %46 = arith.cmpi ne, %45, %c0_i32_11 : i32
    scf.if %46 {
      %c0_17 = arith.constant 0 : index
      %c0_18 = arith.constant 0 : index
      %54 = vector.load %arg5[%c0_17, %c0_18] : memref<16x1xf32, #tpu.memory_space<vmem>>, vector<16x1xf32>
      %55 = arith.addf %54, %39 : vector<16x1xf32>
      %c0_19 = arith.constant 0 : index
      %c0_20 = arith.constant 0 : index
      %56 = vector.load %arg5[%c0_19, %c0_20] : memref<16x1xf32, #tpu.memory_space<vmem>>, vector<16x1xf32>
      tpu.vector_store %arg5[%c0_19, %c0_20], %55 {strides = array<i32>} : memref<16x1xf32, #tpu.memory_space<vmem>>, vector<16x1xf32>,
    } else {
    }
    %c16_i32_12 = arith.constant 16 : i32
    %47 = arith.addi %42, %c16_i32_12 : i32
    %c16_i32_13 = arith.constant 16 : i32
    %48 = arith.cmpi sgt, %47, %c16_i32_13 : i32
    %49 = arith.extui %48 : i1 to i32
    %c0_i32_14 = arith.constant 0 : i32
    %50 = arith.cmpi ne, %49, %c0_i32_14 : i32
    scf.if %50 {
      %54 = tpu.iota {dimensions = array<i32: 0>} : vector<16x1xi32>
      %55 = vector.broadcast %42 : i32 to vector<16x1xi32>
      %56 = arith.addi %55, %54 : vector<16x1xi32>
      %c0_17 = arith.constant 0 : index
      %c0_18 = arith.constant 0 : index
      %57 = vector.load %arg5[%c0_17, %c0_18] : memref<16x1xf32, #tpu.memory_space<vmem>>, vector<16x1xf32>
      %c16_i32_19 = arith.constant 16 : i32
      %58 = vector.broadcast %c16_i32_19 : i32 to vector<16x1xi32>
      %59 = arith.cmpi slt, %56, %58 : vector<16x1xi32>
      %cst_20 = arith.constant 0.000000e+00 : f32
      %60 = vector.broadcast %cst_20 : f32 to vector<16x1xf32>
      %61 = arith.select %59, %39, %60 : vector<16x1xi1>, vector<16x1xf32>
      %62 = arith.addf %57, %61 : vector<16x1xf32>
      %c0_21 = arith.constant 0 : index
      %c0_22 = arith.constant 0 : index
      %63 = vector.load %arg5[%c0_21, %c0_22] : memref<16x1xf32, #tpu.memory_space<vmem>>, vector<16x1xf32>
      tpu.vector_store %arg5[%c0_21, %c0_22], %62 {strides = array<i32>} : memref<16x1xf32, #tpu.memory_space<vmem>>, vector<16x1xf32>,
    } else {
    }
    %c0_i32_15 = arith.constant 0 : i32
    %51 = arith.cmpi eq, %arg1, %c0_i32_15 : i32
    %52 = arith.extui %51 : i1 to i32
    %c0_i32_16 = arith.constant 0 : i32
    %53 = arith.cmpi ne, %52, %c0_i32_16 : i32
    scf.if %53 {
      %c0_17 = arith.constant 0 : index
      %c0_18 = arith.constant 0 : index
      %54 = vector.load %arg5[%c0_17, %c0_18] : memref<16x1xf32, #tpu.memory_space<vmem>>, vector<16x1xf32>
      %55 = vector.shape_cast %54 : vector<16x1xf32> to vector<1x16x1xf32>
      %cst_19 = arith.constant dense<0.000000e+00> : vector<1xf32>
      %56 = vector.multi_reduction <add>, %55, %cst_19 [1, 2] : vector<1x16x1xf32> to vector<1xf32>
      %57 = vector.shape_cast %56 : vector<1xf32> to vector<1x1x1xf32>
      %58 = vector.extract %57[0, 0, 0] : f32 from vector<1x1x1xf32>
      %59 = vector.broadcast %58 : f32 to vector<1x1xf32>
      %60 = vector.shape_cast %59 : vector<1x1xf32> to vector<1x1x1xf32>
      %cst_20 = arith.constant 3.125000e-02 : f32
      %61 = vector.broadcast %cst_20 : f32 to vector<1x1x1xf32>
      %62 = arith.mulf %60, %61 : vector<1x1x1xf32>
      %c0_21 = arith.constant 0 : index
      %c0_22 = arith.constant 0 : index
      %c0_23 = arith.constant 0 : index
      %63 = vector.load %arg4[%c0_21, %c0_22, %c0_23] : memref<1x1x1xf32, #tpu.memory_space<vmem>>, vector<1x1x1xf32>
      tpu.vector_store %arg4[%c0_21, %c0_22, %c0_23], %62 {strides = array<i32>} : memref<1x1x1xf32, #tpu.memory_space<vmem>>, vector<1x1x1xf32>,
    } else {
    }
    return
  }
  func.func @transform_0(%arg0: i32, %arg1: i32) -> (i32, i32) {
    %c1_i32 = arith.constant 1 : i32
    %0 = arith.muli %arg0, %c1_i32 : i32
    %1 = arith.addi %0, %arg1 : i32
    %c0_i32 = arith.constant 0 : i32
    %2 = arith.minsi %1, %c0_i32 : i32
    %c0_i32_0 = arith.constant 0 : i32
    %c0_i32_1 = arith.constant 0 : i32
    return %2, %c0_i32_0 : i32, i32
  }
  func.func @transform_1(%arg0: i32, %arg1: i32) -> (i32, i32) {
    %c1_i32 = arith.constant 1 : i32
    %0 = arith.muli %arg0, %c1_i32 : i32
    %1 = arith.addi %0, %arg1 : i32
    %c0_i32 = arith.constant 0 : i32
    %2 = arith.minsi %1, %c0_i32 : i32
    %c0_i32_0 = arith.constant 0 : i32
    %c0_i32_1 = arith.constant 0 : i32
    return %2, %c0_i32_0 : i32, i32
  }
  func.func @transform_2(%arg0: i32, %arg1: i32) -> (i32, i32, i32) {
    %c0_i32 = arith.constant 0 : i32
    %c0_i32_0 = arith.constant 0 : i32
    %c0_i32_1 = arith.constant 0 : i32
    return %arg0, %c0_i32, %c0_i32_0 : i32, i32, i32
  }
}

</mosaic_0001>

<bundles_post_ra>
// kernel: tpu_custom_call.1
= control target key start
LH: loop header
LB: loop body
LE: loop exit
PB: predicated region body
PF: predicated region fallthrough
CT: control target
= control target key end

     0   :  { %7 = vsyncpa [#allocation4], 0  ;;  %s389_s0 = inlined_call_operand.hbm [shape: f32[16,128], index: 0, kind: input, shape index: {}]   ;;  %s390_s1 = inlined_call_operand.hbm [shape: f32[16,128], index: 1, kind: input, shape index: {}]   ;;  %s391_s2 = inlined_call_operand.hbm [shape: f32[1,1,1], index: 2, kind: output, shape index: {}]  }
   0x1   :  { %8 = vsyncpa [#allocation7], 0 }
   0x2   :  { %9 = vsyncpa [#allocation5], 0  ;;  %s326_s9 = smov [#allocation3]   ;;  %s254_s13 = scalar_lea.hbm %s389_s0, 256 }
   0x3   :  { %s21_s10 = sshll.u32 %s326_s9, 4  ;;  %p255_p0 = scmp.ne.s32.totalorder %s389_s0, %s254_s13  ;;  %s22_s10 = int_to_ptr.vmem [resolvable:$true] %s21_s10 }
   0x4   :  { %p258_p1 = scmp.lt.u32.totalorder %s254_s13, %s389_s0 }
   0x6   :  { %p260_p2 = pnand %p258_p1, %p255_p0 }
   0x8   :  { %263 = shalt.err (!%p260_p2)
}
   0x9   :  { %s264_s18 = scalar_lea.vmem %s22_s10, 256  ;;  %p269_p4 = scmp.lt.s32.totalorder %s22_s10, %s22_s10 }
   0xa   :  { %p265_p3 = scmp.ne.s32.totalorder %s22_s10, %s264_s18  ;;  %p270_p5 = scmp.lt.s32.totalorder %s264_s18, %s264_s18 }
   0xc   :  { %p271_p6 = por %p270_p5, %p269_p4 }
   0xe   :  { %p272_p7 = pnand %p271_p6, %p265_p3 }
  0x10   :  { %275 = shalt.err (!%p272_p7)
}
  0x11   :  { %s327_s19 = smov 128   ;;  %s328_s20 = smov 8  }
  0x12   :  { %27 = dma.hbm_to_vmem [thread:$0]  %s389_s0, 256, %s22_s10, [#allocation4], %s327_s19, %s327_s19, %s328_s20  }
  0x13   :  { %s329_s23 = smov [#allocation6]   ;;  %s276_s27 = scalar_lea.hbm %s390_s1, 256 }
  0x14   :  { %s39_s24 = sshll.u32 %s329_s23, 4  ;;  %p277_p8 = scmp.ne.s32.totalorder %s390_s1, %s276_s27  ;;  %s40_s24 = int_to_ptr.vmem [resolvable:$true] %s39_s24 }
  0x15   :  { %p280_p9 = scmp.lt.u32.totalorder %s276_s27, %s390_s1 }
  0x17   :  { %p282_p10 = pnand %p280_p9, %p277_p8 }
  0x19   :  { %285 = shalt.err (!%p282_p10)
}
  0x1a   :  { %s286_s4 = scalar_lea.vmem %s40_s24, 256  ;;  %p291_p12 = scmp.lt.s32.totalorder %s40_s24, %s40_s24 }
  0x1b   :  { %p287_p11 = scmp.ne.s32.totalorder %s40_s24, %s286_s4  ;;  %p292_p13 = scmp.lt.s32.totalorder %s286_s4, %s286_s4 }
  0x1d   :  { %p293_p0 = por %p292_p13, %p291_p12 }
  0x1f   :  { %p294_p1 = pnand %p293_p0, %p287_p11 }
  0x21   :  { %297 = shalt.err (!%p294_p1)
}
  0x22   :  { %45 = dma.hbm_to_vmem [thread:$0]  %s390_s1, 256, %s40_s24, [#allocation7], %s327_s19, %s327_s19, %s328_s20  }
  0x23   :  { %320 = dma.done.wait [#allocation4], 256  }
  0x24   :  { %321 = vsyncadd [#allocation4], 4294967040 }
  0x25   :  { %322 = dma.done.wait [#allocation7], 256  }
  0x26   :  { %323 = vsyncadd [#allocation7], 4294967040  ;;  %v67_v0 = vld [vmem:[#allocation3] sm:$0xff]  ;;  %v69_v1 = vld [vmem:[#allocation6] sm:$0xff]  ;;  %vm64_vm0 = vcmask 7168   ;;  %v330_v20 = vmov 0.0  }
  0x27   :  { %71 = vmax.xlane.f32.xlu0 %v67_v0  ;;  %77 = vmax.xlane.f32.xlu1 %v69_v1  ;;  %v68_v2 = vld [vmem:[#allocation3 + $0x8] sm:$0xff]  ;;  %v70_v3 = vld [vmem:[#allocation6 + $0x8] sm:$0xff]  ;;  %65 = vst.msk [vmem:[#allocation2] sm:$0xff] %vm64_vm0, %v330_v20  ;;  %66 = vst.msk [vmem:[#allocation2 + $0x8] sm:$0xff] %vm64_vm0, %v330_v20  ;;  %s331_s1 = smov [#allocation8]   ;;  %vm196_vm1 = vcmask 0  }
  0x28   :  { %s204_s6 = sshll.u32 %s331_s1, 4  ;;  %s205_s6 = int_to_ptr.vmem [resolvable:$true] %s204_s6 }
  0x29   :  { %s298_s8 = scalar_lea.vmem %s205_s6, 16  ;;  %s302_s9 = scalar_lea.vmem %s205_s6, 32 }
  0x2a   :  { %p299_p2 = scmp.ne.s32.totalorder %s205_s6, %s298_s8  ;;  %p303_p3 = scmp.lt.s32.totalorder %s205_s6, %s205_s6 }
  0x2b   :  { %73 = vmax.xlane.f32.xlu0 %v68_v2  ;;  %79 = vmax.xlane.f32.xlu1 %v70_v3  ;;  %p304_p4 = scmp.lt.s32.totalorder %s302_s9, %s298_s8 }
  0x2d   :  { %p305_p5 = por %p304_p4, %p303_p3 }
  0x2e   :  { %v148_v62 = vld [vmem:[#allocation2] sm:$0xff] }
  0x2f   :  { %p306_p6 = pnand %p305_p5, %p299_p2 }
  0xb4   :  { %v72_v4 = vpop.xlane.xlu0 %71  ;;  %v78_v5 = vpop.xlane.xlu1 %77 }
  0xb5   :  { %v75_v6 = vsub.f32 %v67_v0, %v72_v4  ;;  %v81_v7 = vsub.f32 %v69_v1, %v78_v5  ;;  %v149_v1 = vld [vmem:[#allocation2 + $0x8] sm:$0xff] }
  0xb7   :  { %v83_v8 = vmul.f32 1.442695, %v75_v6  ;;  %v87_v9 = vmul.f32 1.442695, %v81_v7 }
  0xb8   :  { %v74_v10 = vpop.xlane.xlu0 %73  ;;  %v80_v11 = vpop.xlane.xlu1 %79 }
  0xb9   :  { %226 = vpow2.f32 %v83_v8  ;;  %v76_v12 = vsub.f32 %v68_v2, %v74_v10  ;;  %v82_v13 = vsub.f32 %v70_v3, %v80_v11 }
  0xba   :  { %228 = vpow2.f32 %v87_v9 }
  0xbb   :  { %v85_v14 = vmul.f32 1.442695, %v76_v12  ;;  %v89_v15 = vmul.f32 1.442695, %v82_v13 }
  0xbd   :  { %230 = vpow2.f32 %v85_v14 }
  0xbe   :  { %232 = vpow2.f32 %v89_v15 }
  0xc3   :  { %v227_v16 = vpop.eup %226 }
  0xc4   :  { %91 = vadd.xlane.f32.xlu0 %v227_v16  ;;  %v229_v17 = vpop.eup %228 }
  0xc7   :  { %v231_v18 = vpop.eup %230 }
  0xc8   :  { %95 = vadd.xlane.f32.xlu0 %v229_v17  ;;  %93 = vadd.xlane.f32.xlu1 %v231_v18  ;;  %v233_v19 = vpop.eup %232 }
  0xcc   :  { %97 = vadd.xlane.f32.xlu1 %v233_v19 }
 0x151   :  { %v92_v21 = vpop.xlane.xlu0 %91 }
 0x152   :  { %234 = vrcp.f32 %v92_v21 }
 0x155   :  { %v94_v22 = vpop.xlane.xlu1 %93  ;;  %v96_v23 = vpop.xlane.xlu0 %95 }
 0x156   :  { %236 = vrcp.f32 %v94_v22 }
 0x157   :  { %238 = vrcp.f32 %v96_v23 }
 0x159   :  { %v98_v24 = vpop.xlane.xlu1 %97 }
 0x15a   :  { %240 = vrcp.f32 %v98_v24 }
 0x15c   :  { %v235_v25 = vpop.eup %234 }
 0x15d   :  { %v101_v28 = vmul.f32 %v235_v25, %v227_v16 }
 0x15f   :  { %v109_v37 = vmul.f32 %v101_v28, %v75_v6 }
 0x160   :  { %v237_v26 = vpop.eup %236 }
 0x161   :  { %v239_v27 = vpop.eup %238  ;;  %v102_v32 = vmul.f32 %v237_v26, %v231_v18 }
 0x162   :  { %v105_v29 = vmul.f32 %v239_v27, %v229_v17 }
 0x163   :  { %v110_v43 = vmul.f32 %v102_v32, %v76_v12 }
 0x164   :  { %v241_v30 = vpop.eup %240  ;;  %v107_v31 = vadd.f32 %v105_v29, %v101_v28  ;;  %v111_v35 = vmul.f32 %v105_v29, %v81_v7 }
 0x165   :  { %v106_v33 = vmul.f32 %v241_v30, %v233_v19 }
 0x166   :  { %242 = vlog2.f32 %v107_v31  ;;  %v113_v41 = vadd.f32 %v111_v35, %v109_v37 }
 0x167   :  { %v108_v34 = vadd.f32 %v106_v33, %v102_v32  ;;  %v112_v39 = vmul.f32 %v106_v33, %v82_v13 }
 0x169   :  { %244 = vlog2.f32 %v108_v34  ;;  %v114_v46 = vadd.f32 %v112_v39, %v110_v43 }
 0x16a   :  { %246 = vlog2.f32 %v92_v21 }
 0x16b   :  { %248 = vlog2.f32 %v94_v22 }
 0x16c   :  { %250 = vlog2.f32 %v96_v23 }
 0x16d   :  { %252 = vlog2.f32 %v98_v24 }
 0x170   :  { %v243_v36 = vpop.eup %242 }
 0x171   :  { %v116_v38 = vmul.f32 0.6931472, %v243_v36 }
 0x173   :  { %v245_v40 = vpop.eup %244  ;;  %v119_v42 = vmul.f32 %v116_v38, %v107_v31 }
 0x174   :  { %v118_v44 = vmul.f32 0.6931472, %v245_v40  ;;  %v247_v49 = vpop.eup %246 }
 0x175   :  { %v121_v45 = vsub.f32 %v113_v41, %v119_v42  ;;  %v249_v50 = vpop.eup %248  ;;  %v128_v52 = vmul.f32 0.6931472, %v247_v49 }
 0x176   :  { %v120_v47 = vmul.f32 %v118_v44, %v108_v34  ;;  %v251_v51 = vpop.eup %250  ;;  %v130_v57 = vmul.f32 0.6931472, %v249_v50 }
 0x177   :  { %123 = vadd.xlane.f32.xlu0 %v121_v45  ;;  %v253_v53 = vpop.eup %252  ;;  %v134_v55 = vmul.f32 0.6931472, %v251_v51 }
 0x178   :  { %v122_v48 = vsub.f32 %v114_v46, %v120_v47  ;;  %v136_v60 = vmul.f32 0.6931472, %v253_v53 }
 0x17a   :  { %125 = vadd.xlane.f32.xlu1 %v122_v48 }
 0x204   :  { %v124_v54 = vpop.xlane.xlu0 %123 }
 0x205   :  { %v131_v56 = vsub.f32 %v124_v54, %v128_v52 }
 0x207   :  { %v126_v58 = vpop.xlane.xlu1 %125  ;;  %v137_v59 = vsub.f32 %v131_v56, %v134_v55 }
 0x208   :  { %v132_v61 = vsub.f32 %v126_v58, %v130_v57 }
 0x209   :  { %v139_v63 = vadd.f32 1.3862944, %v137_v59 }
 0x20a   :  { %v138_v0 = vsub.f32 %v132_v61, %v136_v60 }
 0x20b   :  { %v150_v2 = vadd.f32 %v148_v62, %v139_v63 }
 0x20c   :  { %v140_v3 = vadd.f32 1.3862944, %v138_v0 }
 0x20d   :  { %153 = vst.msk [vmem:[#allocation2] sm:$0xff] %vm64_vm0, %v150_v2 }
 0x20e   :  { %v151_v4 = vadd.f32 %v149_v1, %v140_v3 }
 0x210   :  { %154 = vst.msk [vmem:[#allocation2 + $0x8] sm:$0xff] %vm64_vm0, %v151_v4 }
 0x214   :  { %v179_v5 = vld [vmem:[#allocation2] sm:$0xff] }
 0x215   :  { %v182_v7 = vsel %vm64_vm0, %v179_v5, 0.0 }
 0x217   :  { %v180_v6 = vld [vmem:[#allocation2 + $0x8] sm:$0xff] }
 0x218   :  { %v183_v8 = vsel %vm64_vm0, %v180_v6, 0.0 }
 0x219   :  { %v184_v9 = vadd.f32 %v183_v8, %v182_v7 }
 0x21b   :  { %185 = vadd.xlane.f32.xlu0 %v184_v9 }
 0x2a8   :  { %v186_v10 = vpop.xlane.xlu0 %185 }
 0x2a9   :  { %v187_v11 = vrot.slane %v186_v10, 4 }
 0x2ab   :  { %v188_v12 = vadd.f32 %v187_v11, %v186_v10 }
 0x2ad   :  { %v189_v13 = vrot.slane %v188_v12, 2 }
 0x2af   :  { %v190_v14 = vadd.f32 %v189_v13, %v188_v12 }
 0x2b1   :  { %v191_v15 = vrot.slane %v190_v14, 1 }
 0x2b3   :  { %v192_v16 = vadd.f32 %v191_v15, %v190_v14 }
 0x2b5   :  { %218 = vpush %v192_v16 }
 0x2e6   :  { %s219_s7 = spop %218 }
 0x2e7   :  { %v194_v17 = vstv %s219_s7 }
 0x2e8   :  { %v195_v18 = vmul.f32 0.03125, %v194_v17 }
 0x2ea   :  { %197 = vst.msk [vmem:[#allocation8] sm:$0x1] %vm196_vm1, %v195_v18 }
 0x2eb   :  { %309 = shalt.err (!%p306_p6)
}
 0x2ec   :  { %s310_s12 = scalar_lea.hbm %s391_s2, 16 }
 0x2ed   :  { %p311_p7 = scmp.ne.s32.totalorder %s391_s2, %s310_s12  ;;  %p314_p8 = scmp.lt.u32.totalorder %s310_s12, %s391_s2 }
 0x2ef   :  { %p316_p9 = pnand %p314_p8, %p311_p7 }
 0x2f1   :  { %319 = shalt.err (!%p316_p9)
}
 0x2f2   :  { %207 = dma.vmem_to_hbm [thread:$0]  %s205_s6, 16, %s391_s2, [#allocation5]  }
 0x2f3   :  { %324 = dma.done.wait [#allocation5], 16  }
 0x2f4   :  { %325 = vsyncadd [#allocation5], 4294967280 }
 0x2f5   :  { %211 = vsyncpa [#allocation4], 1 }
 0x2f6   :  { %212 = vsyncpa [#allocation7], 1 }
 0x2f7   :  { %213 = vsyncpa [#allocation5], 1 }

</bundles_post_ra>
